<compile_context>
chip_gen: v7x
topology: tpu7x:2x2x1
jax: 0.10.0
libtpu: 0.0.40
codegen_flags: <defaults>
</compile_context>

<pallas_src>
import functools

import jax
import jax.numpy as jnp
from jax import lax
from jax.experimental import pallas as pl
from jax.experimental.pallas import tpu as pltpu

_LANES = 128
_SUB = 8                                  # f32 sublanes; partial tile is (8,128)
_EPSILON = 1e-7

# Fused single-kernel path (slab resident in VMEM, 1 read + 1 write).
_FAST_PATH_MAX_ELEMS = 1 << 20            # 1M elems (~4 MiB f32 slab)
_FAST_PATH_VMEM_LIMIT = 40 * 1024 * 1024  # well below v7x's 64 MiB/TC physical

# Pipelined two-pass path block sizes (rows of the (rows, 128) slab).
_MINMAX_BLOCK_ROWS = 8192   # read-only pass: 4 MiB f32 / 2 MiB bf16 per buffer
_QUANT_BLOCK_ROWS = 4096    # in+out pass: 8 MiB double-buffered f32, fits v5e


# ----------------------------------------------------------------------------
# Kernels
# ----------------------------------------------------------------------------
def _masked_minmax_sources(x, start_row, n_valid):
    """Replace elements whose flat index >= n_valid by +/-inf (min/max neutral).

    Covers both zero-padding (numel % 128 != 0) and the unspecified values in
    a last grid block that overhangs the array.  Flat index uses int32, so the
    tensor must have < 2**31 elements (always true in practice).
    """
    row = lax.broadcasted_iota(jnp.int32, x.shape, 0)
    lane = lax.broadcasted_iota(jnp.int32, x.shape, 1)
    flat = (start_row + row) * _LANES + lane
    valid = flat < n_valid
    return jnp.where(valid, x, jnp.inf), jnp.where(valid, x, -jnp.inf)


def _fused_roundtobits_kernel(x_ref, o_ref, *, qmax, n_valid, need_mask):
    """Single-pass RoundToBits for a VMEM-resident slab (no grid)."""
    x = x_ref[...].astype(jnp.float32)
    if need_mask:
        x_min_src, x_max_src = _masked_minmax_sources(x, 0, n_valid)
    else:
        x_min_src, x_max_src = x, x
    fp_min = jnp.min(x_min_src)
    fp_max = jnp.max(x_max_src)
    # qmin == 0
    scale = (fp_max - fp_min) / qmax + _EPSILON
    bias = 0.0 - jnp.round(fp_min / scale)
    # Keep x / scale (not x * (1/scale)) for bit-exact parity with reference.
    q = jnp.clip(jnp.round(x / scale + bias), 0.0, qmax)
    o_ref[...] = ((q - bias) * scale).astype(o_ref.dtype)


def _partial_minmax_kernel(x_ref, mn_ref, mx_ref, *, block_rows, n_valid,
                           need_mask):
    """Per-block partial min/max (parallel across blocks / TensorCores)."""
    x = x_ref[...].astype(jnp.float32)
    if need_mask:
        start_row = pl.program_id(0) * block_rows
        x_min_src, x_max_src = _masked_minmax_sources(x, start_row, n_valid)
    else:
        x_min_src, x_max_src = x, x
    if block_rows % _SUB == 0:
        # Reduce only over the leading whole-vreg axis: pure VPU min/max,
        # no XLU cross-lane traffic inside the HBM-bound pass.
        mn = jnp.min(x_min_src.reshape(-1, _SUB, _LANES), axis=0)
        mx = jnp.max(x_max_src.reshape(-1, _SUB, _LANES), axis=0)
    else:
        mn = jnp.full((_SUB, _LANES), jnp.min(x_min_src), jnp.float32)
        mx = jnp.full((_SUB, _LANES), jnp.max(x_max_src), jnp.float32)
    mn_ref[0] = mn
    mx_ref[0] = mx


def _roundtobits_kernel(scale_ref, bias_ref, x_ref, o_ref, *, qmax):
    """qout = (clamp(round(x/scale + bias), 0, qmax) - bias) * scale."""
    scale = scale_ref[0]
    bias = bias_ref[0]
    x = x_ref[...].astype(jnp.float32)
    q = jnp.clip(jnp.round(x / scale + bias), 0.0, qmax)
    o_ref[...] = ((q - bias) * scale).astype(o_ref.dtype)


def _binarize_kernel(x_ref, o_ref):
    """TorchBinarize: clamp [-1,1] -> [0,1] -> round -> {-1,+1}."""
    x = x_ref[...].astype(jnp.float32)
    x = jnp.clip(x, -1.0, 1.0)
    x = jnp.round((x + 1.0) * 0.5)
    o_ref[...] = (x * 2.0 - 1.0).astype(o_ref.dtype)


# ----------------------------------------------------------------------------
# Glue (slab layout, block selection, pallas_call wrappers)
# ----------------------------------------------------------------------------
def _to_slab(x):
    """Flatten to a lane-dense (rows, 128) slab.  Returns (slab, n_valid).

    No copy when numel % 128 == 0 (the common case); otherwise a single small
    zero pad (values are masked in-kernel, so padding contents don't matter).
    """
    flat = x.reshape(-1)
    n = flat.shape[0]
    rows = pl.cdiv(n, _LANES)
    padded = rows * _LANES
    if padded != n:
        flat = jnp.pad(flat, (0, padded - n))
    return flat.reshape(rows, _LANES), n


def _from_slab(slab, n, shape):
    if slab.size == n:
        return slab.reshape(shape)   # free reshape, no copy
    return slab.reshape(-1)[:n].reshape(shape)


def _pick_block(rows, max_rows):
    """(block_rows, num_blocks); full-array block when it already fits."""
    if rows <= max_rows:
        return rows, 1
    return max_rows, pl.cdiv(rows, max_rows)


def _binarize(x):
    slab, n = _to_slab(x)
    rows = slab.shape[0]
    block_rows, nblocks = _pick_block(rows, _QUANT_BLOCK_ROWS)
    itemsize = slab.dtype.itemsize
    out = pl.pallas_call(
        _binarize_kernel,
        out_shape=jax.ShapeDtypeStruct(slab.shape, slab.dtype),
        grid=(nblocks,),
        in_specs=[pl.BlockSpec((block_rows, _LANES), lambda i: (i, 0))],
        out_specs=pl.BlockSpec((block_rows, _LANES), lambda i: (i, 0)),
        compiler_params=pltpu.CompilerParams(dimension_semantics=("parallel",)),
        cost_estimate=pl.CostEstimate(flops=4 * n, transcendentals=0,
                                      bytes_accessed=2 * slab.size * itemsize),
    )(slab)
    return _from_slab(out, n, x.shape)


def _round_to_bits(x, bits, *,
                   fast_path_max_elems=_FAST_PATH_MAX_ELEMS,
                   minmax_block_rows=_MINMAX_BLOCK_ROWS,
                   quant_block_rows=_QUANT_BLOCK_ROWS):
    slab, n = _to_slab(x)
    rows = slab.shape[0]
    total = rows * _LANES
    itemsize = slab.dtype.itemsize
    qmax = float(2 ** bits - 1)
    tail_mask = total != n

    # ---- Fast path: slab resident in VMEM, one fused kernel (1 read + 1 write)
    if n <= fast_path_max_elems:
        out = pl.pallas_call(
            functools.partial(_fused_roundtobits_kernel, qmax=qmax,
                              n_valid=n, need_mask=tail_mask),
            out_shape=jax.ShapeDtypeStruct(slab.shape, slab.dtype),
            compiler_params=pltpu.CompilerParams(
                vmem_limit_bytes=_FAST_PATH_VMEM_LIMIT),
            cost_estimate=pl.CostEstimate(flops=8 * n, transcendentals=0,
                                          bytes_accessed=2 * total * itemsize),
        )(slab)
        return _from_slab(out, n, x.shape)

    # ---- Pass 1: per-block partial min/max, fully parallel (both TCs on v7x)
    mm_rows, mm_blocks = _pick_block(rows, minmax_block_rows)
    mm_mask = tail_mask or (mm_blocks * mm_rows != rows)
    mins, maxs = pl.pallas_call(
        functools.partial(_partial_minmax_kernel, block_rows=mm_rows,
                          n_valid=n, need_mask=mm_mask),
        out_shape=(jax.ShapeDtypeStruct((mm_blocks, _SUB, _LANES), jnp.float32),
                   jax.ShapeDtypeStruct((mm_blocks, _SUB, _LANES), jnp.float32)),
        grid=(mm_blocks,),
        in_specs=[pl.BlockSpec((mm_rows, _LANES), lambda i: (i, 0))],
        out_specs=(pl.BlockSpec((1, _SUB, _LANES), lambda i: (i, 0, 0)),
                   pl.BlockSpec((1, _SUB, _LANES), lambda i: (i, 0, 0))),
        compiler_params=pltpu.CompilerParams(dimension_semantics=("parallel",)),
        cost_estimate=pl.CostEstimate(flops=2 * n, transcendentals=0,
                                      bytes_accessed=total * itemsize),
    )(slab)

    # Tiny final reduce (mm_blocks * 4 KiB) + scalar scale/bias math in jnp.
    fp_min = jnp.min(mins)
    fp_max = jnp.max(maxs)
    scale = (fp_max - fp_min) / qmax + _EPSILON          # qmin == 0
    bias = 0.0 - jnp.round(fp_min / scale)
    scale = scale.astype(jnp.float32).reshape(1)
    bias = bias.astype(jnp.float32).reshape(1)

    # ---- Pass 2: elementwise quantize/dequantize, parallel grid
    q_rows, q_blocks = _pick_block(rows, quant_block_rows)
    out = pl.pallas_call(
        functools.partial(_roundtobits_kernel, qmax=qmax),
        out_shape=jax.ShapeDtypeStruct(slab.shape, slab.dtype),
        grid=(q_blocks,),
        in_specs=[pl.BlockSpec(memory_space=pltpu.SMEM),   # scale
                  pl.BlockSpec(memory_space=pltpu.SMEM),   # bias
                  pl.BlockSpec((q_rows, _LANES), lambda i: (i, 0))],
        out_specs=pl.BlockSpec((q_rows, _LANES), lambda i: (i, 0)),
        compiler_params=pltpu.CompilerParams(dimension_semantics=("parallel",)),
        cost_estimate=pl.CostEstimate(flops=6 * n, transcendentals=0,
                                      bytes_accessed=2 * total * itemsize),
    )(scale, bias, slab)
    return _from_slab(out, n, x.shape)


def torch_quantize(x, bits=0):
    """Pallas equivalent of TorchQuantize(bits).forward(x)."""
    if bits == 0:
        # nn.Identity(): no HBM traffic, no kernel launch.
        return x
    if bits == 2:
        raise NotImplementedError("Ternarize Function is not Implemented Yet!")
    if x.size == 0:
        return x

    orig_dtype = x.dtype
    # Keep bf16 I/O in bf16 (halves HBM traffic); anything else runs as f32.
    if orig_dtype in (jnp.dtype(jnp.float32), jnp.dtype(jnp.bfloat16)):
        compute_dtype = orig_dtype
    else:
        compute_dtype = jnp.float32
    xc = x.astype(compute_dtype)

    if bits == 1:
        out = _binarize(xc)
    else:
        out = _round_to_bits(xc, bits)
    return out.astype(orig_dtype)


# ----------------------------------------------------------------------------
# Pure-JAX references for correctness checks
# ----------------------------------------------------------------------------
def _ref_round_to_bits(x, bits, eps=1e-7):
    fp_max = jnp.max(x)
    fp_min = jnp.min(x)
    qmax = float(2 ** bits - 1)
    scale = (fp_max - fp_min) / qmax + eps
    bias = 0.0 - jnp.round(fp_min / scale)
    return (jnp.clip(jnp.round(x / scale + bias), 0.0, qmax) - bias) * scale


def _ref_binarize(x):
    x = jnp.clip(x, -1.0, 1.0)
    return jnp.round((x + 1.0) / 2.0) * 2.0 - 1.0


if __name__ == "__main__":
    key = jax.random.PRNGKey(0)
    k1, k2, k3 = jax.random.split(key, 3)

    # NCHW input, like the PyTorch module would see: (batch=2, C=4, H=16, W=16)
    x = jax.random.normal(k1, (2, 4, 16, 16), dtype=jnp.float32) * 1.5

    # bits > 2 : fused single-kernel VMEM-resident path
    out4 = torch_quantize(x, bits=4)
    jax.block_until_ready(out4)
    ref4 = _ref_round_to_bits(x, 4)
    assert jnp.allclose(out4, ref4, atol=1e-5, rtol=1e-5), "bits=4 mismatch"

    # bits == 1 : binarize path
    out1 = torch_quantize(x, bits=1)
    jax.block_until_ready(out1)
    assert jnp.allclose(out1, _ref_binarize(x)), "bits=1 mismatch"

    # bits == 0 : identity path (no kernel)
    out0 = torch_quantize(x, bits=0)
    jax.block_until_ready(out0)
    assert jnp.allclose(out0, x), "bits=0 mismatch"
    assert out0.dtype == x.dtype and out4.dtype == x.dtype and out1.dtype == x.dtype

    # numel % 128 != 0 : exercises the in-kernel ragged-tail masking
    x_odd = jax.random.normal(k2, (2, 3, 7, 11), dtype=jnp.float32)
    out_odd = torch_quantize(x_odd, bits=3)
    jax.block_until_ready(out_odd)
    assert jnp.allclose(out_odd, _ref_round_to_bits(x_odd, 3),
                        atol=1e-5, rtol=1e-5), "odd-size bits=3 mismatch"
    out_odd1 = torch_quantize(x_odd, bits=1)
    jax.block_until_ready(out_odd1)
    assert jnp.allclose(out_odd1, _ref_binarize(x_odd)), "odd-size bits=1 mismatch"

    # Force the large-tensor two-pass path (parallel partial min/max + SMEM
    # scale/bias scalars + uneven last grid block) at a small shape.
    x_big = jax.random.normal(k3, (2, 4, 16, 18), dtype=jnp.float32) * 2.0
    out_2p = _round_to_bits(x_big, 4, fast_path_max_elems=0,
                            minmax_block_rows=8, quant_block_rows=8)
    jax.block_until_ready(out_2p)
    assert jnp.allclose(out_2p, _ref_round_to_bits(x_big, 4),
                        atol=1e-5, rtol=1e-5), "two-pass bits=4 mismatch"

    print("KERNEL_OK")
</pallas_src>

<mosaic_0001>
module attributes {stable_mosaic.version = 11 : i64} {
  func.func @_fused_roundtobits_kernel(%arg0: memref<16x128xf32, #tpu.memory_space<vmem>>, %arg1: memref<16x128xf32, #tpu.memory_space<vmem>>) attributes {dimension_semantics = [], scalar_prefetch = 0 : i64, scratch_operands = 0 : i64, tpu.core_type = #tpu.core_type<tc>} {
    %c0 = arith.constant 0 : index
    %c0_0 = arith.constant 0 : index
    %0 = vector.load %arg0[%c0, %c0_0] : memref<16x128xf32, #tpu.memory_space<vmem>>, vector<16x128xf32>
    %1 = vector.shape_cast %0 : vector<16x128xf32> to vector<1x16x128xf32>
    %cst = arith.constant dense<0x7F800000> : vector<1xf32>
    %2 = vector.multi_reduction <minimumf>, %1, %cst [1, 2] : vector<1x16x128xf32> to vector<1xf32>
    %3 = vector.shape_cast %2 : vector<1xf32> to vector<1x1x1xf32>
    %4 = vector.extract %3[0, 0, 0] : f32 from vector<1x1x1xf32>
    %5 = vector.shape_cast %0 : vector<16x128xf32> to vector<1x16x128xf32>
    %cst_1 = arith.constant dense<0xFF800000> : vector<1xf32>
    %6 = vector.multi_reduction <maximumf>, %5, %cst_1 [1, 2] : vector<1x16x128xf32> to vector<1xf32>
    %7 = vector.shape_cast %6 : vector<1xf32> to vector<1x1x1xf32>
    %8 = vector.extract %7[0, 0, 0] : f32 from vector<1x1x1xf32>
    %9 = arith.subf %8, %4 : f32
    %cst_2 = arith.constant 1.500000e+01 : f32
    %10 = arith.divf %9, %cst_2 : f32
    %cst_3 = arith.constant 1.000000e-07 : f32
    %11 = arith.addf %10, %cst_3 : f32
    %12 = arith.divf %4, %11 : f32
    %13 = math.roundeven %12 : f32
    %cst_4 = arith.constant 0.000000e+00 : f32
    %14 = arith.subf %cst_4, %13 : f32
    %15 = vector.broadcast %11 : f32 to vector<16x128xf32>
    %16 = arith.divf %0, %15 : vector<16x128xf32>
    %17 = vector.broadcast %14 : f32 to vector<16x128xf32>
    %18 = arith.addf %16, %17 : vector<16x128xf32>
    %19 = math.roundeven %18 : vector<16x128xf32>
    %cst_5 = arith.constant 0.000000e+00 : f32
    %cst_6 = arith.constant 1.500000e+01 : f32
    %20 = vector.broadcast %cst_5 : f32 to vector<16x128xf32>
    %21 = arith.maximumf %20, %19 : vector<16x128xf32>
    %22 = vector.broadcast %cst_6 : f32 to vector<16x128xf32>
    %23 = arith.minimumf %22, %21 : vector<16x128xf32>
    %24 = vector.broadcast %14 : f32 to vector<16x128xf32>
    %25 = arith.subf %23, %24 : vector<16x128xf32>
    %26 = vector.broadcast %11 : f32 to vector<16x128xf32>
    %27 = arith.mulf %25, %26 : vector<16x128xf32>
    %c0_7 = arith.constant 0 : index
    %c0_8 = arith.constant 0 : index
    %28 = vector.load %arg1[%c0_7, %c0_8] : memref<16x128xf32, #tpu.memory_space<vmem>>, vector<16x128xf32>
    tpu.vector_store %arg1[%c0_7, %c0_8], %27 {strides = array<i32>} : memref<16x128xf32, #tpu.memory_space<vmem>>, vector<16x128xf32>,
    return
  }
}

</mosaic_0001>

<bundles_post_ra>
// kernel: tpu_custom_call.1
= control target key start
LH: loop header
LB: loop body
LE: loop exit
PB: predicated region body
PF: predicated region fallthrough
CT: control target
= control target key end

     0   :  { %6 = vsyncpa [#allocation3], 0  ;;  %s205_s0 = inlined_call_operand.hbm [shape: f32[16,128], index: 0, kind: input, shape index: {}]   ;;  %s206_s1 = inlined_call_operand.hbm [shape: f32[16,128], index: 1, kind: output, shape index: {}]  }
   0x1   :  { %7 = vsyncpa [#allocation4], 0  ;;  %s161_s6 = smov [#allocation2]   ;;  %s113_s10 = scalar_lea.hbm %s205_s0, 256 }
   0x2   :  { %s13_s7 = sshll.u32 %s161_s6, 4  ;;  %p114_p0 = scmp.ne.s32.totalorder %s205_s0, %s113_s10  ;;  %s14_s7 = int_to_ptr.vmem [resolvable:$true] %s13_s7 }
   0x3   :  { %p117_p1 = scmp.lt.u32.totalorder %s113_s10, %s205_s0 }
   0x5   :  { %p119_p2 = pnand %p117_p1, %p114_p0 }
   0x7   :  { %122 = shalt.err (!%p119_p2)
}
   0x8   :  { %s123_s15 = scalar_lea.vmem %s14_s7, 256  ;;  %p128_p4 = scmp.lt.s32.totalorder %s14_s7, %s14_s7 }
   0x9   :  { %p124_p3 = scmp.ne.s32.totalorder %s14_s7, %s123_s15  ;;  %p129_p5 = scmp.lt.s32.totalorder %s123_s15, %s123_s15 }
   0xb   :  { %p130_p6 = por %p129_p5, %p128_p4 }
   0xd   :  { %p131_p7 = pnand %p130_p6, %p124_p3 }
   0xf   :  { %134 = shalt.err (!%p131_p7)
}
  0x10   :  { %s162_s16 = smov 128   ;;  %s163_s17 = smov 8  }
  0x11   :  { %19 = dma.hbm_to_vmem [thread:$0]  %s205_s0, 256, %s14_s7, [#allocation3], %s162_s16, %s162_s16, %s163_s17  }
  0x12   :  { %157 = dma.done.wait [#allocation3], 256  }
  0x13   :  { %158 = vsyncadd [#allocation3], 4294967040  ;;  %v23_v0 = vld [vmem:[#allocation2] sm:$0xff]  ;;  %v24_v1 = vld [vmem:[#allocation2 + $0x8] sm:$0xff]  ;;  %s164_s4 = smov [#allocation5]  }
  0x14   :  { %v25_v2 = vmin.f32 %v23_v0, %v24_v1  ;;  %v35_v3 = vmax.f32 %v23_v0, %v24_v1  ;;  %s87_s5 = sshll.u32 %s164_s4, 4  ;;  %s88_s5 = int_to_ptr.vmem [resolvable:$true] %s87_s5 }
  0x15   :  { %s135_s6 = scalar_lea.vmem %s88_s5, 256  ;;  %p140_p10 = scmp.lt.s32.totalorder %s88_s5, %s88_s5 }
  0x16   :  { %26 = vmin.xlane.f32.xlu0 %v25_v2  ;;  %p136_p9 = scmp.ne.s32.totalorder %s88_s5, %s135_s6  ;;  %p141_p11 = scmp.lt.s32.totalorder %s135_s6, %s135_s6 }
  0x18   :  { %p142_p12 = por %p141_p11, %p140_p10 }
  0x1a   :  { %36 = vmax.xlane.f32.xlu0 %v35_v3  ;;  %p143_p13 = pnand %p142_p12, %p136_p9 }
  0xa3   :  { %v27_v4 = vpop.xlane.xlu0 %26 }
  0xa4   :  { %v28_v5 = vrot.slane %v27_v4, 4 }
  0xa6   :  { %v29_v6 = vmin.f32 %v27_v4, %v28_v5 }
  0xa7   :  { %v37_v7 = vpop.xlane.xlu0 %36 }
  0xa8   :  { %v30_v8 = vrot.slane %v29_v6, 2  ;;  %v38_v9 = vrot.slane %v37_v7, 4 }
  0xaa   :  { %v39_v10 = vmax.f32 %v37_v7, %v38_v9  ;;  %v31_v11 = vmin.f32 %v29_v6, %v30_v8 }
  0xac   :  { %v40_v12 = vrot.slane %v39_v10, 2  ;;  %v32_v13 = vrot.slane %v31_v11, 1 }
  0xae   :  { %v41_v14 = vmax.f32 %v39_v10, %v40_v12  ;;  %v33_v15 = vmin.f32 %v31_v11, %v32_v13 }
  0xb0   :  { %99 = vpush %v33_v15  ;;  %v42_v16 = vrot.slane %v41_v14, 1 }
  0xb2   :  { %v43_v17 = vmax.f32 %v41_v14, %v42_v16 }
  0xb4   :  { %101 = vpush %v43_v17 }
  0xe1   :  { %s100_s0 = spop %99 }
  0xe5   :  { %s102_s20 = spop %101 }
  0xe6   :  { %s45_s21 = ssub.f32 %s102_s20, %s100_s0 }
  0xe8   :  { %s48_s22 = smul.f32 0.06666667, %s45_s21 }
  0xea   :  { %s49_s23 = sadd.f32 1e-07, %s48_s22 }
  0xec   :  { %v50_v18 = vstv %s49_s23 }
  0xed   :  { %111 = vrcp.f32 %v50_v18 }
  0xf7   :  { %v112_v19 = vpop.eup %111 }
  0xf8   :  { %103 = vpush %v112_v19  ;;  %v65_v20 = vmul.f32 %v112_v19, %v23_v0  ;;  %v66_v21 = vmul.f32 %v112_v19, %v24_v1 }
 0x129   :  { %s104_s24 = spop %103 }
 0x12a   :  { %s53_s25 = smul.f32 %s104_s24, %s100_s0 }
 0x12c   :  { %s54_s26 = scvt.f32.s32 %s53_s25  ;;  %s59_s27 = sand.u32 2147483647, %s53_s25 }
 0x12d   :  { %s57_s29 = sand.u32 2147483648, %s53_s25  ;;  %p60_p8 = scmp.lt.f32.partialorder %s59_s27, 2.1474836e+09 }
 0x12e   :  { %s55_s28 = scvt.s32.f32 %s54_s26 }
 0x130   :  { %s56_s30 = sand.u32 2147483647, %s55_s28 }
 0x131   :  { %s58_s2 = sor.u32 %s57_s29, %s56_s30 }
 0x132   :  { %s208_s2 = smov (!%p60_p8, %s58_s2), %s53_s25 }
 0x133   :  { %s62_s3 = ssub.f32 0.0, %s208_s2 }
 0x135   :  { %v67_v22 = vstv %s62_s3 }
 0x136   :  { %v68_v23 = vadd.f32 %v67_v22, %v65_v20  ;;  %v69_v24 = vadd.f32 %v67_v22, %v66_v21 }
 0x138   :  { %v105_v25 = vround.rtne.f32 %v68_v23  ;;  %v106_v26 = vround.rtne.f32 %v69_v24 }
 0x13a   :  { %v72_v27 = vmax.f32 %v105_v25, 0.0  ;;  %v73_v28 = vmax.f32 %v106_v26, 0.0 }
 0x13c   :  { %v74_v29 = vmin.f32 %v72_v27, 15.0  ;;  %v75_v30 = vmin.f32 %v73_v28, 15.0 }
 0x13e   :  { %v76_v31 = vsub.f32 %v74_v29, %v67_v22  ;;  %v77_v32 = vsub.f32 %v75_v30, %v67_v22 }
 0x140   :  { %v78_v33 = vmul.f32 %v76_v31, %v50_v18  ;;  %v79_v34 = vmul.f32 %v77_v32, %v50_v18 }
 0x142   :  { %80 = vst [vmem:[#allocation5] sm:$0xff] %v78_v33  ;;  %81 = vst [vmem:[#allocation5 + $0x8] sm:$0xff] %v79_v34 }
 0x143   :  { %146 = shalt.err (!%p143_p13)
}
 0x144   :  { %s147_s9 = scalar_lea.hbm %s206_s1, 256 }
 0x145   :  { %p148_p0 = scmp.ne.s32.totalorder %s206_s1, %s147_s9  ;;  %p151_p1 = scmp.lt.u32.totalorder %s147_s9, %s206_s1 }
 0x147   :  { %p153_p2 = pnand %p151_p1, %p148_p0 }
 0x149   :  { %156 = shalt.err (!%p153_p2)
}
 0x14a   :  { %93 = dma.vmem_to_hbm [thread:$0]  %s88_s5, 256, %s206_s1, [#allocation4], %s162_s16, %s162_s16, %s163_s17  }
 0x14b   :  { %159 = dma.done.wait [#allocation4], 256  }
 0x14c   :  { %160 = vsyncadd [#allocation4], 4294967040 }
 0x14d   :  { %97 = vsyncpa [#allocation3], 1 }
 0x14e   :  { %98 = vsyncpa [#allocation4], 1 }

</bundles_post_ra>
